<compile_context>
chip_gen: v6e
topology: v6e:2x2x1
jax: 0.10.0
libtpu: 0.0.40
codegen_flags: <defaults>
</compile_context>

<pallas_src>
import jax
import jax.numpy as jnp
from jax import lax
from jax.experimental import pallas as pl
from jax.experimental.pallas import tpu as pltpu


# -----------------------------------------------------------------------------
# GLULN block (pure value-level helper used inside the fused kernel):
#   out = LayerNorm(sigmoid(x @ W1 + b1) * (x @ W2 + b2) + y)
# with W = [W1 | W2] concatenated along N and p = [b1, b2, gamma, beta].
# -----------------------------------------------------------------------------
def _gluln_block(x_in, y_f32, w, p, d_model):
    h = jnp.dot(x_in, w, preferred_element_type=jnp.float32)        # (S, 2*D) f32
    h1 = h[:, :d_model] + p[0:1].astype(jnp.float32)
    h2 = h[:, d_model:] + p[1:2].astype(jnp.float32)
    z = jax.nn.sigmoid(h1) * h2 + y_f32
    mean = jnp.mean(z, axis=-1, keepdims=True)
    zc = z - mean
    var = jnp.mean(zc * zc, axis=-1, keepdims=True)                 # population var
    norm = zc * lax.rsqrt(var + 1e-5)                               # nn.LayerNorm eps
    return norm * p[2:3].astype(jnp.float32) + p[3:4].astype(jnp.float32)


# -----------------------------------------------------------------------------
# Fused decoder kernel: one batch element per grid step.
# -----------------------------------------------------------------------------
def decoder_kernel(x_ref, g1w_ref, g1p_ref, aw_ref, ab_ref, mask_ref,
                   g2w_ref, g2p_ref,
                   delta_ref, phi_ref, attw_ref):
    # x_ref    : (1, S, D)       input rows for one batch element
    # g1w_ref  : (D, 2D)         GLULN1 [W1 | W2]
    # g1p_ref  : (4, D)          GLULN1 [b1, b2, gamma, beta]
    # aw_ref   : (4, D, D)       [Wq*scale, Wk, Wv, Wo]
    # ab_ref   : (4, D)          [bq*scale, bk, bv, bo]
    # mask_ref : (S, S)          additive causal bias (0 / -inf), f32
    # g2w_ref  : (D, 2D)         GLULN2 [W1 | W2]
    # g2p_ref  : (4, D)          GLULN2 [b1, b2, gamma, beta]
    # delta_ref: (1, S, D)       glu_delta
    # phi_ref  : (1, S, D)       glu_phi
    # attw_ref : (1, S, S)       attention weights
    d_model = x_ref.shape[-1]
    cdtype = x_ref.dtype                       # consistent MXU operand dtype

    x = x_ref[0]                               # (S, D)

    # ---- GLULN1(x, x) -------------------------------------------------------
    phi_f32 = _gluln_block(x, x.astype(jnp.float32),
                           g1w_ref[...], g1p_ref[...], d_model)
    phi = phi_f32.astype(cdtype)
    phi_ref[0] = phi.astype(phi_ref.dtype)

    # ---- single-head causal self-attention (scale pre-folded into Wq/bq) ----
    q = (jnp.dot(phi, aw_ref[0], preferred_element_type=jnp.float32)
         + ab_ref[0:1]).astype(cdtype)
    k = (jnp.dot(phi, aw_ref[1], preferred_element_type=jnp.float32)
         + ab_ref[1:2]).astype(cdtype)
    v = (jnp.dot(phi, aw_ref[2], preferred_element_type=jnp.float32)
         + ab_ref[2:3]).astype(cdtype)

    # q @ k^T without an explicit transpose (contract the feature dims).
    scores = lax.dot_general(q, k, (((1,), (1,)), ((), ())),
                             preferred_element_type=jnp.float32)    # (S, S)
    scores = scores + mask_ref[...]                                 # causal -inf bias

    m = jnp.max(scores, axis=-1, keepdims=True)
    e = jnp.exp(scores - m)
    p_att = e * pl.reciprocal(jnp.sum(e, axis=-1, keepdims=True), approx=True)
    attw_ref[0] = p_att.astype(attw_ref.dtype)

    ctx = jnp.dot(p_att.astype(cdtype), v,
                  preferred_element_type=jnp.float32).astype(cdtype)
    attn_out = (jnp.dot(ctx, aw_ref[3], preferred_element_type=jnp.float32)
                + ab_ref[3:4]).astype(cdtype)

    # ---- GLULN2(attn_out, phi) ----------------------------------------------
    delta_f32 = _gluln_block(attn_out, phi_f32,
                             g2w_ref[...], g2p_ref[...], d_model)
    delta_ref[0] = delta_f32.astype(delta_ref.dtype)


# -----------------------------------------------------------------------------
# One-time parameter fusion (no per-call jnp.stack / HBM copies in the forward).
# -----------------------------------------------------------------------------
def prepare_decoder_params(params, seq_len):
    w1, b1, w2, b2, g1, be1 = params["gluln1"]
    w1b, b1b, w2b, b2b, g2, be2 = params["gluln2"]
    wq, bq, wk, bk, wv, bv, wo, bo = params["mha"]
    d_model = wq.shape[0]
    scale = d_model ** -0.5

    g1w = jnp.concatenate([w1, w2], axis=1)                          # (D, 2D)
    g1p = jnp.stack([b1, b2, g1, be1], axis=0)                       # (4, D)
    g2w = jnp.concatenate([w1b, w2b], axis=1)                        # (D, 2D)
    g2p = jnp.stack([b1b, b2b, g2, be2], axis=0)                     # (4, D)
    aw = jnp.stack([wq * scale, wk, wv, wo], axis=0)                 # (4, D, D)
    ab = jnp.stack([bq * scale, bk, bv, bo], axis=0)                 # (4, D)

    row = jnp.arange(seq_len)[:, None]
    col = jnp.arange(seq_len)[None, :]
    mask = jnp.where(col > row, -jnp.inf, 0.0).astype(jnp.float32)   # (S, S)

    return dict(g1w=g1w, g1p=g1p, aw=aw, ab=ab, mask=mask, g2w=g2w, g2p=g2p)


# -----------------------------------------------------------------------------
# Full decoder forward (single fused pallas_call).
# -----------------------------------------------------------------------------
def temporal_fusion_decoder(vsn_observed, fused, *,
                            vmem_limit_bytes=48 * 1024 * 1024):
    """Returns (glu_delta, glu_phi, decoder_attention) as in the PyTorch module."""
    bsz, seq, d = vsn_observed.shape
    dm2 = fused["g1w"].shape[1]
    dt = vsn_observed.dtype

    const2 = lambda b: (0, 0)
    const3 = lambda b: (0, 0, 0)

    glu_delta, glu_phi, attw = pl.pallas_call(
        decoder_kernel,
        out_shape=(
            jax.ShapeDtypeStruct((bsz, seq, d), dt),     # glu_delta
            jax.ShapeDtypeStruct((bsz, seq, d), dt),     # glu_phi
            jax.ShapeDtypeStruct((bsz, seq, seq), dt),   # attention weights
        ),
        grid_spec=pltpu.PrefetchScalarGridSpec(
            num_scalar_prefetch=0,
            grid=(bsz,),
            in_specs=[
                pl.BlockSpec((1, seq, d), lambda b: (b, 0, 0)),   # x
                pl.BlockSpec((d, dm2), const2),                   # GLULN1 [W1|W2]
                pl.BlockSpec((4, d), const2),                     # GLULN1 [b1,b2,g,b]
                pl.BlockSpec((4, d, d), const3),                  # [Wq*s,Wk,Wv,Wo]
                pl.BlockSpec((4, d), const2),                     # [bq*s,bk,bv,bo]
                pl.BlockSpec((seq, seq), const2),                 # causal bias
                pl.BlockSpec((d, dm2), const2),                   # GLULN2 [W1|W2]
                pl.BlockSpec((4, d), const2),                     # GLULN2 [b1,b2,g,b]
            ],
            out_specs=[
                pl.BlockSpec((1, seq, d), lambda b: (b, 0, 0)),
                pl.BlockSpec((1, seq, d), lambda b: (b, 0, 0)),
                pl.BlockSpec((1, seq, seq), lambda b: (b, 0, 0)),
            ],
        ),
        compiler_params=pltpu.CompilerParams(
            dimension_semantics=("parallel",),
            vmem_limit_bytes=vmem_limit_bytes,
        ),
    )(vsn_observed, fused["g1w"], fused["g1p"], fused["aw"], fused["ab"],
      fused["mask"], fused["g2w"], fused["g2p"])

    return glu_delta, glu_phi, attw


# -----------------------------------------------------------------------------
# Pure-JAX reference for verification (uses the UNFUSED params).
# -----------------------------------------------------------------------------
def _gluln_ref(x, y, w1, b1, w2, b2, gamma, beta):
    h1 = jnp.einsum("bsd,df->bsf", x, w1, precision="highest") + b1
    h2 = jnp.einsum("bsd,df->bsf", x, w2, precision="highest") + b2
    z = jax.nn.sigmoid(h1) * h2 + y
    mean = jnp.mean(z, axis=-1, keepdims=True)
    var = jnp.mean((z - mean) ** 2, axis=-1, keepdims=True)
    return (z - mean) * lax.rsqrt(var + 1e-5) * gamma + beta


def _mha1_ref(x, wq, bq, wk, bk, wv, bv, wo, bo):
    q = jnp.einsum("bsd,df->bsf", x, wq, precision="highest") + bq
    k = jnp.einsum("bsd,df->bsf", x, wk, precision="highest") + bk
    v = jnp.einsum("bsd,df->bsf", x, wv, precision="highest") + bv
    d = x.shape[-1]
    seq = x.shape[1]
    s = jnp.einsum("bqd,bkd->bqk", q, k, precision="highest") * (d ** -0.5)
    mask = jnp.triu(jnp.ones((seq, seq), dtype=bool), k=1)
    s = jnp.where(mask[None], -jnp.inf, s)
    p = jax.nn.softmax(s, axis=-1)
    out = jnp.einsum("bqk,bkd->bqd", p, v, precision="highest")
    out = jnp.einsum("bsd,df->bsf", out, wo, precision="highest") + bo
    return out, p


def _decoder_ref(x, params):
    phi = _gluln_ref(x, x, *params["gluln1"])
    attn_out, attn_w = _mha1_ref(phi, *params["mha"])
    delta = _gluln_ref(attn_out, phi, *params["gluln2"])
    return delta, phi, attn_w


if __name__ == "__main__":
    batch, seq_len, d_model = 2, 8, 32   # small shapes consistent with the module
    key = jax.random.PRNGKey(0)
    ks = list(jax.random.split(key, 17))

    def linear_params(kw, kb, d_in, d_out):
        # Weights stored transposed, shape (d_in, d_out), so kernels do x @ W.
        bound = 1.0 / (d_in ** 0.5)
        w = jax.random.uniform(kw, (d_in, d_out), jnp.float32, -bound, bound)
        b = jax.random.uniform(kb, (d_out,), jnp.float32, -bound, bound)
        return w, b

    def gluln_params(k0, k1, k2, k3, d):
        w1, b1 = linear_params(k0, k1, d, d)
        w2, b2 = linear_params(k2, k3, d, d)
        gamma = jnp.ones((d,), jnp.float32)   # nn.LayerNorm defaults
        beta = jnp.zeros((d,), jnp.float32)
        return (w1, b1, w2, b2, gamma, beta)

    wq, bq = linear_params(ks[0], ks[1], d_model, d_model)
    wk, bk = linear_params(ks[2], ks[3], d_model, d_model)
    wv, bv = linear_params(ks[4], ks[5], d_model, d_model)
    wo, bo = linear_params(ks[6], ks[7], d_model, d_model)

    params = {
        "gluln1": gluln_params(ks[8], ks[9], ks[10], ks[11], d_model),
        "gluln2": gluln_params(ks[12], ks[13], ks[14], ks[15], d_model),
        "mha": (wq, bq, wk, bk, wv, bv, wo, bo),
    }

    vsn_observed = jax.random.normal(ks[16], (batch, seq_len, d_model), jnp.float32)

    fused = prepare_decoder_params(params, seq_len)   # one-time weight fusion
    glu_delta, glu_phi, attn_w = temporal_fusion_decoder(vsn_observed, fused)
    glu_delta, glu_phi, attn_w = jax.block_until_ready((glu_delta, glu_phi, attn_w))

    ref_delta, ref_phi, ref_attn = _decoder_ref(vsn_observed, params)

    assert glu_delta.shape == (batch, seq_len, d_model)
    assert glu_phi.shape == (batch, seq_len, d_model)
    assert attn_w.shape == (batch, seq_len, seq_len)
    assert jnp.allclose(glu_phi, ref_phi, atol=2e-3, rtol=2e-3)
    assert jnp.allclose(attn_w, ref_attn, atol=2e-3, rtol=2e-3)
    assert jnp.allclose(glu_delta, ref_delta, atol=2e-3, rtol=2e-3)
    print("KERNEL_OK")
</pallas_src>

<mosaic_0001>
module attributes {stable_mosaic.version = 11 : i64} {
  func.func @decoder_kernel(%arg0: i32, %arg1: memref<1x8x32xf32, #tpu.memory_space<vmem>>, %arg2: memref<32x64xf32, #tpu.memory_space<vmem>>, %arg3: memref<4x32xf32, #tpu.memory_space<vmem>>, %arg4: memref<4x32x32xf32, #tpu.memory_space<vmem>>, %arg5: memref<4x32xf32, #tpu.memory_space<vmem>>, %arg6: memref<8x8xf32, #tpu.memory_space<vmem>>, %arg7: memref<32x64xf32, #tpu.memory_space<vmem>>, %arg8: memref<4x32xf32, #tpu.memory_space<vmem>>, %arg9: memref<1x8x32xf32, #tpu.memory_space<vmem>>, %arg10: memref<1x8x32xf32, #tpu.memory_space<vmem>>, %arg11: memref<1x8x8xf32, #tpu.memory_space<vmem>>) attributes {dimension_semantics = [#tpu.dimension_semantics<parallel>], iteration_bounds = array<i64: 2>, scalar_prefetch = 0 : i64, scratch_operands = 0 : i64, tpu.core_type = #tpu.core_type<tc>, window_params = [{transform_indices = @transform_0, window_bounds = array<i64: 1, 8, 32>}, {pipeline_mode = #tpu.pipeline_mode<synchronous>, transform_indices = @transform_1, window_bounds = array<i64: 32, 64>}, {pipeline_mode = #tpu.pipeline_mode<synchronous>, transform_indices = @transform_2, window_bounds = array<i64: 4, 32>}, {pipeline_mode = #tpu.pipeline_mode<synchronous>, transform_indices = @transform_3, window_bounds = array<i64: 4, 32, 32>}, {pipeline_mode = #tpu.pipeline_mode<synchronous>, transform_indices = @transform_4, window_bounds = array<i64: 4, 32>}, {pipeline_mode = #tpu.pipeline_mode<synchronous>, transform_indices = @transform_5, window_bounds = array<i64: 8, 8>}, {pipeline_mode = #tpu.pipeline_mode<synchronous>, transform_indices = @transform_6, window_bounds = array<i64: 32, 64>}, {pipeline_mode = #tpu.pipeline_mode<synchronous>, transform_indices = @transform_7, window_bounds = array<i64: 4, 32>}, {transform_indices = @transform_8, window_bounds = array<i64: 1, 8, 32>}, {transform_indices = @transform_9, window_bounds = array<i64: 1, 8, 32>}, {transform_indices = @transform_10, window_bounds = array<i64: 1, 8, 8>}]} {
    %c0 = arith.constant 0 : index
    %c0_0 = arith.constant 0 : index
    %c0_1 = arith.constant 0 : index
    %0 = vector.load %arg1[%c0, %c0_0, %c0_1] : memref<1x8x32xf32, #tpu.memory_space<vmem>>, vector<1x8x32xf32>
    %1 = vector.shape_cast %0 : vector<1x8x32xf32> to vector<8x32xf32>
    %c0_2 = arith.constant 0 : index
    %c0_3 = arith.constant 0 : index
    %2 = vector.load %arg2[%c0_2, %c0_3] : memref<32x64xf32, #tpu.memory_space<vmem>>, vector<32x64xf32>
    %c0_4 = arith.constant 0 : index
    %c0_5 = arith.constant 0 : index
    %3 = vector.load %arg3[%c0_4, %c0_5] : memref<4x32xf32, #tpu.memory_space<vmem>>, vector<4x32xf32>
    %cst = arith.constant dense<0.000000e+00> : vector<8x64xf32>
    %4 = tpu.matmul %1, %2, %cst {dimension_numbers = #tpu.dot_dimension_numbers<[1], [0], [0], [1], [0, 0, 1, 1], [], []>} : vector<8x32xf32>, vector<32x64xf32>, vector<8x64xf32> -> vector<8x64xf32>
    %5 = vector.extract_strided_slice %4 {offsets = [0, 0], sizes = [8, 32], strides = [1, 1]} : vector<8x64xf32> to vector<8x32xf32>
    %6 = vector.extract_strided_slice %3 {offsets = [0, 0], sizes = [1, 32], strides = [1, 1]} : vector<4x32xf32> to vector<1x32xf32>
    %7 = vector.broadcast %6 : vector<1x32xf32> to vector<8x32xf32>
    %8 = arith.addf %5, %7 : vector<8x32xf32>
    %9 = vector.extract_strided_slice %4 {offsets = [0, 32], sizes = [8, 32], strides = [1, 1]} : vector<8x64xf32> to vector<8x32xf32>
    %10 = vector.extract_strided_slice %3 {offsets = [1, 0], sizes = [1, 32], strides = [1, 1]} : vector<4x32xf32> to vector<1x32xf32>
    %11 = vector.broadcast %10 : vector<1x32xf32> to vector<8x32xf32>
    %12 = arith.addf %9, %11 : vector<8x32xf32>
    %13 = arith.negf %8 : vector<8x32xf32>
    %14 = math.exp %13 : vector<8x32xf32>
    %cst_6 = arith.constant 1.000000e+00 : f32
    %15 = vector.broadcast %cst_6 : f32 to vector<8x32xf32>
    %16 = arith.addf %15, %14 : vector<8x32xf32>
    %17 = arith.divf %15, %16 : vector<8x32xf32>
    %18 = arith.mulf %17, %12 : vector<8x32xf32>
    %19 = arith.addf %18, %1 : vector<8x32xf32>
    %cst_7 = arith.constant dense<0.000000e+00> : vector<8xf32>
    %20 = vector.multi_reduction <add>, %19, %cst_7 [1] : vector<8x32xf32> to vector<8xf32>
    %21 = vector.shape_cast %20 : vector<8xf32> to vector<8x1xf32>
    %cst_8 = arith.constant 3.200000e+01 : f32
    %22 = vector.broadcast %cst_8 : f32 to vector<8x1xf32>
    %23 = arith.divf %21, %22 : vector<8x1xf32>
    %24 = vector.broadcast %23 : vector<8x1xf32> to vector<8x32xf32>
    %25 = arith.subf %19, %24 : vector<8x32xf32>
    %26 = arith.mulf %25, %25 : vector<8x32xf32>
    %cst_9 = arith.constant dense<0.000000e+00> : vector<8xf32>
    %27 = vector.multi_reduction <add>, %26, %cst_9 [1] : vector<8x32xf32> to vector<8xf32>
    %28 = vector.shape_cast %27 : vector<8xf32> to vector<8x1xf32>
    %cst_10 = arith.constant 3.200000e+01 : f32
    %29 = vector.broadcast %cst_10 : f32 to vector<8x1xf32>
    %30 = arith.divf %28, %29 : vector<8x1xf32>
    %cst_11 = arith.constant 9.99999974E-6 : f32
    %31 = vector.broadcast %cst_11 : f32 to vector<8x1xf32>
    %32 = arith.addf %30, %31 : vector<8x1xf32>
    %33 = math.rsqrt %32 : vector<8x1xf32>
    %34 = vector.broadcast %33 : vector<8x1xf32> to vector<8x32xf32>
    %35 = arith.mulf %25, %34 : vector<8x32xf32>
    %36 = vector.extract_strided_slice %3 {offsets = [2, 0], sizes = [1, 32], strides = [1, 1]} : vector<4x32xf32> to vector<1x32xf32>
    %37 = vector.broadcast %36 : vector<1x32xf32> to vector<8x32xf32>
    %38 = arith.mulf %35, %37 : vector<8x32xf32>
    %39 = vector.extract_strided_slice %3 {offsets = [3, 0], sizes = [1, 32], strides = [1, 1]} : vector<4x32xf32> to vector<1x32xf32>
    %40 = vector.broadcast %39 : vector<1x32xf32> to vector<8x32xf32>
    %41 = arith.addf %38, %40 : vector<8x32xf32>
    %c0_12 = arith.constant 0 : index
    %c0_13 = arith.constant 0 : index
    %c0_14 = arith.constant 0 : index
    %42 = vector.load %arg10[%c0_12, %c0_13, %c0_14] : memref<1x8x32xf32, #tpu.memory_space<vmem>>, vector<1x8x32xf32>
    %43 = vector.shape_cast %42 : vector<1x8x32xf32> to vector<8x32xf32>
    %44 = vector.shape_cast %41 : vector<8x32xf32> to vector<1x8x32xf32>
    tpu.vector_store %arg10[%c0_12, %c0_13, %c0_14], %44 {strides = array<i32>} : memref<1x8x32xf32, #tpu.memory_space<vmem>>, vector<1x8x32xf32>,
    %c0_15 = arith.constant 0 : index
    %c0_16 = arith.constant 0 : index
    %c0_17 = arith.constant 0 : index
    %45 = vector.load %arg4[%c0_15, %c0_16, %c0_17] : memref<4x32x32xf32, #tpu.memory_space<vmem>>, vector<1x32x32xf32>
    %46 = vector.shape_cast %45 : vector<1x32x32xf32> to vector<32x32xf32>
    %cst_18 = arith.constant dense<0.000000e+00> : vector<8x32xf32>
    %47 = tpu.matmul %41, %46, %cst_18 {dimension_numbers = #tpu.dot_dimension_numbers<[1], [0], [0], [1], [0, 0, 1, 1], [], []>} : vector<8x32xf32>, vector<32x32xf32>, vector<8x32xf32> -> vector<8x32xf32>
    %c0_19 = arith.constant 0 : index
    %c0_20 = arith.constant 0 : index
    %48 = vector.load %arg5[%c0_19, %c0_20] : memref<4x32xf32, #tpu.memory_space<vmem>>, vector<1x32xf32>
    %49 = vector.broadcast %48 : vector<1x32xf32> to vector<8x32xf32>
    %50 = arith.addf %47, %49 : vector<8x32xf32>
    %c1 = arith.constant 1 : index
    %c0_21 = arith.constant 0 : index
    %c0_22 = arith.constant 0 : index
    %51 = vector.load %arg4[%c1, %c0_21, %c0_22] : memref<4x32x32xf32, #tpu.memory_space<vmem>>, vector<1x32x32xf32>
    %52 = vector.shape_cast %51 : vector<1x32x32xf32> to vector<32x32xf32>
    %cst_23 = arith.constant dense<0.000000e+00> : vector<8x32xf32>
    %53 = tpu.matmul %41, %52, %cst_23 {dimension_numbers = #tpu.dot_dimension_numbers<[1], [0], [0], [1], [0, 0, 1, 1], [], []>} : vector<8x32xf32>, vector<32x32xf32>, vector<8x32xf32> -> vector<8x32xf32>
    %c1_24 = arith.constant 1 : index
    %c0_25 = arith.constant 0 : index
    %54 = vector.load %arg5[%c1_24, %c0_25] : memref<4x32xf32, #tpu.memory_space<vmem>>, vector<1x32xf32>
    %55 = vector.broadcast %54 : vector<1x32xf32> to vector<8x32xf32>
    %56 = arith.addf %53, %55 : vector<8x32xf32>
    %c2 = arith.constant 2 : index
    %c0_26 = arith.constant 0 : index
    %c0_27 = arith.constant 0 : index
    %57 = vector.load %arg4[%c2, %c0_26, %c0_27] : memref<4x32x32xf32, #tpu.memory_space<vmem>>, vector<1x32x32xf32>
    %58 = vector.shape_cast %57 : vector<1x32x32xf32> to vector<32x32xf32>
    %cst_28 = arith.constant dense<0.000000e+00> : vector<8x32xf32>
    %59 = tpu.matmul %41, %58, %cst_28 {dimension_numbers = #tpu.dot_dimension_numbers<[1], [0], [0], [1], [0, 0, 1, 1], [], []>} : vector<8x32xf32>, vector<32x32xf32>, vector<8x32xf32> -> vector<8x32xf32>
    %c2_29 = arith.constant 2 : index
    %c0_30 = arith.constant 0 : index
    %60 = vector.load %arg5[%c2_29, %c0_30] : memref<4x32xf32, #tpu.memory_space<vmem>>, vector<1x32xf32>
    %61 = vector.broadcast %60 : vector<1x32xf32> to vector<8x32xf32>
    %62 = arith.addf %59, %61 : vector<8x32xf32>
    %cst_31 = arith.constant dense<0.000000e+00> : vector<8x8xf32>
    %63 = tpu.matmul %50, %56, %cst_31 {dimension_numbers = #tpu.dot_dimension_numbers<[1], [1], [0], [0], [0, 0, 1, 0], [], []>} : vector<8x32xf32>, vector<8x32xf32>, vector<8x8xf32> -> vector<8x8xf32>
    %c0_32 = arith.constant 0 : index
    %c0_33 = arith.constant 0 : index
    %64 = vector.load %arg6[%c0_32, %c0_33] : memref<8x8xf32, #tpu.memory_space<vmem>>, vector<8x8xf32>
    %65 = arith.addf %63, %64 : vector<8x8xf32>
    %cst_34 = arith.constant dense<0xFF800000> : vector<8xf32>
    %66 = vector.multi_reduction <maximumf>, %65, %cst_34 [1] : vector<8x8xf32> to vector<8xf32>
    %67 = vector.shape_cast %66 : vector<8xf32> to vector<8x1xf32>
    %68 = vector.broadcast %67 : vector<8x1xf32> to vector<8x8xf32>
    %69 = arith.subf %65, %68 : vector<8x8xf32>
    %70 = math.exp %69 : vector<8x8xf32>
    %cst_35 = arith.constant dense<0.000000e+00> : vector<8xf32>
    %71 = vector.multi_reduction <add>, %70, %cst_35 [1] : vector<8x8xf32> to vector<8xf32>
    %72 = vector.shape_cast %71 : vector<8xf32> to vector<8x1xf32>
    %73 = tpu.reciprocal %72 {approx = true} : vector<8x1xf32> -> vector<8x1xf32>
    %74 = vector.broadcast %73 : vector<8x1xf32> to vector<8x8xf32>
    %75 = arith.mulf %70, %74 : vector<8x8xf32>
    %c0_36 = arith.constant 0 : index
    %c0_37 = arith.constant 0 : index
    %c0_38 = arith.constant 0 : index
    %76 = vector.load %arg11[%c0_36, %c0_37, %c0_38] : memref<1x8x8xf32, #tpu.memory_space<vmem>>, vector<1x8x8xf32>
    %77 = vector.shape_cast %76 : vector<1x8x8xf32> to vector<8x8xf32>
    %78 = vector.shape_cast %75 : vector<8x8xf32> to vector<1x8x8xf32>
    tpu.vector_store %arg11[%c0_36, %c0_37, %c0_38], %78 {strides = array<i32>} : memref<1x8x8xf32, #tpu.memory_space<vmem>>, vector<1x8x8xf32>,
    %cst_39 = arith.constant dense<0.000000e+00> : vector<8x32xf32>
    %79 = tpu.matmul %75, %62, %cst_39 {dimension_numbers = #tpu.dot_dimension_numbers<[1], [0], [0], [1], [0, 0, 1, 1], [], []>} : vector<8x8xf32>, vector<8x32xf32>, vector<8x32xf32> -> vector<8x32xf32>
    %c3 = arith.constant 3 : index
    %c0_40 = arith.constant 0 : index
    %c0_41 = arith.constant 0 : index
    %80 = vector.load %arg4[%c3, %c0_40, %c0_41] : memref<4x32x32xf32, #tpu.memory_space<vmem>>, vector<1x32x32xf32>
    %81 = vector.shape_cast %80 : vector<1x32x32xf32> to vector<32x32xf32>
    %cst_42 = arith.constant dense<0.000000e+00> : vector<8x32xf32>
    %82 = tpu.matmul %79, %81, %cst_42 {dimension_numbers = #tpu.dot_dimension_numbers<[1], [0], [0], [1], [0, 0, 1, 1], [], []>} : vector<8x32xf32>, vector<32x32xf32>, vector<8x32xf32> -> vector<8x32xf32>
    %c3_43 = arith.constant 3 : index
    %c0_44 = arith.constant 0 : index
    %83 = vector.load %arg5[%c3_43, %c0_44] : memref<4x32xf32, #tpu.memory_space<vmem>>, vector<1x32xf32>
    %84 = vector.broadcast %83 : vector<1x32xf32> to vector<8x32xf32>
    %85 = arith.addf %82, %84 : vector<8x32xf32>
    %c0_45 = arith.constant 0 : index
    %c0_46 = arith.constant 0 : index
    %86 = vector.load %arg7[%c0_45, %c0_46] : memref<32x64xf32, #tpu.memory_space<vmem>>, vector<32x64xf32>
    %c0_47 = arith.constant 0 : index
    %c0_48 = arith.constant 0 : index
    %87 = vector.load %arg8[%c0_47, %c0_48] : memref<4x32xf32, #tpu.memory_space<vmem>>, vector<4x32xf32>
    %cst_49 = arith.constant dense<0.000000e+00> : vector<8x64xf32>
    %88 = tpu.matmul %85, %86, %cst_49 {dimension_numbers = #tpu.dot_dimension_numbers<[1], [0], [0], [1], [0, 0, 1, 1], [], []>} : vector<8x32xf32>, vector<32x64xf32>, vector<8x64xf32> -> vector<8x64xf32>
    %89 = vector.extract_strided_slice %88 {offsets = [0, 0], sizes = [8, 32], strides = [1, 1]} : vector<8x64xf32> to vector<8x32xf32>
    %90 = vector.extract_strided_slice %87 {offsets = [0, 0], sizes = [1, 32], strides = [1, 1]} : vector<4x32xf32> to vector<1x32xf32>
    %91 = vector.broadcast %90 : vector<1x32xf32> to vector<8x32xf32>
    %92 = arith.addf %89, %91 : vector<8x32xf32>
    %93 = vector.extract_strided_slice %88 {offsets = [0, 32], sizes = [8, 32], strides = [1, 1]} : vector<8x64xf32> to vector<8x32xf32>
    %94 = vector.extract_strided_slice %87 {offsets = [1, 0], sizes = [1, 32], strides = [1, 1]} : vector<4x32xf32> to vector<1x32xf32>
    %95 = vector.broadcast %94 : vector<1x32xf32> to vector<8x32xf32>
    %96 = arith.addf %93, %95 : vector<8x32xf32>
    %97 = arith.negf %92 : vector<8x32xf32>
    %98 = math.exp %97 : vector<8x32xf32>
    %cst_50 = arith.constant 1.000000e+00 : f32
    %99 = vector.broadcast %cst_50 : f32 to vector<8x32xf32>
    %100 = arith.addf %99, %98 : vector<8x32xf32>
    %101 = arith.divf %99, %100 : vector<8x32xf32>
    %102 = arith.mulf %101, %96 : vector<8x32xf32>
    %103 = arith.addf %102, %41 : vector<8x32xf32>
    %cst_51 = arith.constant dense<0.000000e+00> : vector<8xf32>
    %104 = vector.multi_reduction <add>, %103, %cst_51 [1] : vector<8x32xf32> to vector<8xf32>
    %105 = vector.shape_cast %104 : vector<8xf32> to vector<8x1xf32>
    %cst_52 = arith.constant 3.200000e+01 : f32
    %106 = vector.broadcast %cst_52 : f32 to vector<8x1xf32>
    %107 = arith.divf %105, %106 : vector<8x1xf32>
    %108 = vector.broadcast %107 : vector<8x1xf32> to vector<8x32xf32>
    %109 = arith.subf %103, %108 : vector<8x32xf32>
    %110 = arith.mulf %109, %109 : vector<8x32xf32>
    %cst_53 = arith.constant dense<0.000000e+00> : vector<8xf32>
    %111 = vector.multi_reduction <add>, %110, %cst_53 [1] : vector<8x32xf32> to vector<8xf32>
    %112 = vector.shape_cast %111 : vector<8xf32> to vector<8x1xf32>
    %cst_54 = arith.constant 3.200000e+01 : f32
    %113 = vector.broadcast %cst_54 : f32 to vector<8x1xf32>
    %114 = arith.divf %112, %113 : vector<8x1xf32>
    %cst_55 = arith.constant 9.99999974E-6 : f32
    %115 = vector.broadcast %cst_55 : f32 to vector<8x1xf32>
    %116 = arith.addf %114, %115 : vector<8x1xf32>
    %117 = math.rsqrt %116 : vector<8x1xf32>
    %118 = vector.broadcast %117 : vector<8x1xf32> to vector<8x32xf32>
    %119 = arith.mulf %109, %118 : vector<8x32xf32>
    %120 = vector.extract_strided_slice %87 {offsets = [2, 0], sizes = [1, 32], strides = [1, 1]} : vector<4x32xf32> to vector<1x32xf32>
    %121 = vector.broadcast %120 : vector<1x32xf32> to vector<8x32xf32>
    %122 = arith.mulf %119, %121 : vector<8x32xf32>
    %123 = vector.extract_strided_slice %87 {offsets = [3, 0], sizes = [1, 32], strides = [1, 1]} : vector<4x32xf32> to vector<1x32xf32>
    %124 = vector.broadcast %123 : vector<1x32xf32> to vector<8x32xf32>
    %125 = arith.addf %122, %124 : vector<8x32xf32>
    %c0_56 = arith.constant 0 : index
    %c0_57 = arith.constant 0 : index
    %c0_58 = arith.constant 0 : index
    %126 = vector.load %arg9[%c0_56, %c0_57, %c0_58] : memref<1x8x32xf32, #tpu.memory_space<vmem>>, vector<1x8x32xf32>
    %127 = vector.shape_cast %126 : vector<1x8x32xf32> to vector<8x32xf32>
    %128 = vector.shape_cast %125 : vector<8x32xf32> to vector<1x8x32xf32>
    tpu.vector_store %arg9[%c0_56, %c0_57, %c0_58], %128 {strides = array<i32>} : memref<1x8x32xf32, #tpu.memory_space<vmem>>, vector<1x8x32xf32>,
    return
  }
  func.func @transform_0(%arg0: i32) -> (i32, i32, i32) {
    %c0_i32 = arith.constant 0 : i32
    %c0_i32_0 = arith.constant 0 : i32
    %c0_i32_1 = arith.constant 0 : i32
    return %arg0, %c0_i32, %c0_i32_0 : i32, i32, i32
  }
  func.func @transform_1(%arg0: i32) -> (i32, i32) {
    %c0_i32 = arith.constant 0 : i32
    %c0_i32_0 = arith.constant 0 : i32
    %c0_i32_1 = arith.constant 0 : i32
    return %c0_i32, %c0_i32_0 : i32, i32
  }
  func.func @transform_2(%arg0: i32) -> (i32, i32) {
    %c0_i32 = arith.constant 0 : i32
    %c0_i32_0 = arith.constant 0 : i32
    %c0_i32_1 = arith.constant 0 : i32
    return %c0_i32, %c0_i32_0 : i32, i32
  }
  func.func @transform_3(%arg0: i32) -> (i32, i32, i32) {
    %c0_i32 = arith.constant 0 : i32
    %c0_i32_0 = arith.constant 0 : i32
    %c0_i32_1 = arith.constant 0 : i32
    %c0_i32_2 = arith.constant 0 : i32
    return %c0_i32, %c0_i32_0, %c0_i32_1 : i32, i32, i32
  }
  func.func @transform_4(%arg0: i32) -> (i32, i32) {
    %c0_i32 = arith.constant 0 : i32
    %c0_i32_0 = arith.constant 0 : i32
    %c0_i32_1 = arith.constant 0 : i32
    return %c0_i32, %c0_i32_0 : i32, i32
  }
  func.func @transform_5(%arg0: i32) -> (i32, i32) {
    %c0_i32 = arith.constant 0 : i32
    %c0_i32_0 = arith.constant 0 : i32
    %c0_i32_1 = arith.constant 0 : i32
    return %c0_i32, %c0_i32_0 : i32, i32
  }
  func.func @transform_6(%arg0: i32) -> (i32, i32) {
    %c0_i32 = arith.constant 0 : i32
    %c0_i32_0 = arith.constant 0 : i32
    %c0_i32_1 = arith.constant 0 : i32
    return %c0_i32, %c0_i32_0 : i32, i32
  }
  func.func @transform_7(%arg0: i32) -> (i32, i32) {
    %c0_i32 = arith.constant 0 : i32
    %c0_i32_0 = arith.constant 0 : i32
    %c0_i32_1 = arith.constant 0 : i32
    return %c0_i32, %c0_i32_0 : i32, i32
  }
  func.func @transform_8(%arg0: i32) -> (i32, i32, i32) {
    %c0_i32 = arith.constant 0 : i32
    %c0_i32_0 = arith.constant 0 : i32
    %c0_i32_1 = arith.constant 0 : i32
    return %arg0, %c0_i32, %c0_i32_0 : i32, i32, i32
  }
  func.func @transform_9(%arg0: i32) -> (i32, i32, i32) {
    %c0_i32 = arith.constant 0 : i32
    %c0_i32_0 = arith.constant 0 : i32
    %c0_i32_1 = arith.constant 0 : i32
    return %arg0, %c0_i32, %c0_i32_0 : i32, i32, i32
  }
  func.func @transform_10(%arg0: i32) -> (i32, i32, i32) {
    %c0_i32 = arith.constant 0 : i32
    %c0_i32_0 = arith.constant 0 : i32
    %c0_i32_1 = arith.constant 0 : i32
    return %arg0, %c0_i32, %c0_i32_0 : i32, i32, i32
  }
}

</mosaic_0001>

<bundles_post_ra>
// kernel: tpu_custom_call.1
= control target key start
LH: loop header
LB: loop body
LE: loop exit
PB: predicated region body
PF: predicated region fallthrough
CT: control target
= control target key end

     0   :  { %s2475_s0 = inlined_call_operand.hbm [shape: f32[2,8,32], index: 0, kind: input, shape index: {}]   ;;  %s2476_s1 = inlined_call_operand.hbm [shape: f32[32,64], index: 1, kind: input, shape index: {}]   ;;  %s2477_s2 = inlined_call_operand.hbm [shape: f32[4,32], index: 2, kind: input, shape index: {}]   ;;  %s2478_s3 = inlined_call_operand.hbm [shape: f32[4,32,32], index: 3, kind: input, shape index: {}]   ;;  %s2479_s4 = inlined_call_operand.hbm [shape: f32[4,32], index: 4, kind: input, shape index: {}]   ;;  %s2480_s5 = inlined_call_operand.vmem [shape: f32[8,8], index: 5, kind: input, shape index: {}]   ;;  %s2481_s6 = inlined_call_operand.hbm [shape: f32[32,64], index: 6, kind: input, shape index: {}]   ;;  %s2482_s7 = inlined_call_operand.vmem [shape: f32[4,32], index: 7, kind: input, shape index: {}]   ;;  %s2483_s8 = inlined_call_operand.hbm [shape: f32[2,8,32], index: 8, kind: output, shape index: {0}]   ;;  %s2484_s9 = inlined_call_operand.hbm [shape: f32[2,8,32], index: 9, kind: output, shape index: {1}]   ;;  %s2485_s10 = inlined_call_operand.hbm [shape: f32[2,8,8], index: 10, kind: output, shape index: {2}]  }
   0x1   :  { %2491 = sst [smem:[#allocation23_spill]] %s2476_s1 }
   0x2   :  { %2492 = sst [smem:[#allocation24_spill]] %s2477_s2 }
   0x3   :  { %2493 = sst [smem:[#allocation25_spill]] %s2478_s3 }
   0x4   :  { %2494 = sst [smem:[#allocation26_spill]] %s2479_s4 }
   0x5   :  { %2495 = sst [smem:[#allocation27_spill]] %s2481_s6 }
   0x6   :  { %16 = vsyncpa [#allocation3], 0 }
   0x7   :  { %18 = vsyncpa [#allocation3 + $0x1], 0 }
   0x8   :  { %19 = vsyncpa [#allocation6], 0 }
   0x9   :  { %20 = vsyncpa [#allocation9], 0 }
   0xa   :  { %21 = vsyncpa [#allocation12], 0 }
   0xb   :  { %22 = vsyncpa [#allocation4], 0 }
   0xc   :  { %24 = vsyncpa [#allocation4 + $0x1], 0 }
   0xd   :  { %25 = vsyncpa [#allocation15], 0 }
   0xe   :  { %27 = vsyncpa [#allocation15 + $0x1], 0  ;;  %s2082_s13 = smov 0   ;;  %s2084_s14 = smov 0  }
   0xf   :  { %s2086_s15 = smov 0   ;;  %s2088_s16 = smov 0  }
  0x10 LB: > { %s2012_s17 = smov [#allocation5]   ;;  %s2103_s19 = sadd.s32 4294967295, %s2010_s16   ;;  %s2010_s16 = sphi %s2088_s16, %s2524_s16   ;;  %s2006_s15 = sphi %s2086_s15, %s2523_s15   ;;  %s2002_s14 = sphi %s2084_s14, %s2522_s14   ;;  %s1998_s13 = sphi %s2082_s13, %s2521_s13  }
  0x11   : > { %s301_s18 = sshll.u32 %s2012_s17, 4  ;;  %p1439_p0 = scmp.ge.s32.totalorder %s2010_s16, 1  ;;  %s302_s18 = int_to_ptr.vmem [resolvable:$true] %s301_s18 }
  0x12   : > { %p2486_p1 = scmp.eq.s32.totalorder %s2103_s19, 0  ;;  %p289_p2 = scmp.lt.s32.totalorder %s2010_s16, 3 }
  0x13   : > { %s2013_s21 = smov [#allocation8]   ;;  %s2014_s24 = smov [#allocation7]  }
  0x14   : > { %p2108_p3 = pnand %p1439_p0, %p289_p2  ;;  %s325_s22 = sshll.u32 %s2013_s21, 4  ;;  %s2121_s22 = int_to_ptr.vmem [resolvable:$true] %s325_s22 }
  0x15   : > { %s315_s25 = sshll.u32 %s2014_s24, 4  ;;  %s1731_s27 = scalar_lea.vmem %s302_s18, 512  ;;  %s2123_s25 = int_to_ptr.vmem [resolvable:$true] %s315_s25 }
  0x16   : > { %s2496_s20 = scalar_select %p2108_p3, 1, 0 }
  0x17   : > { %p1619_p5 = pneg %p2108_p3  ;;  %p1732_p8 = scmp.ne.s32.totalorder %s302_s18, %s1731_s27 }
  0x18   : > { %p1739_p11 = scmp.lt.s32.totalorder %s302_s18, %s302_s18  ;;  %p1740_p12 = scmp.lt.s32.totalorder %s1731_s27, %s1731_s27 }
  0x19   : > { %p2117_p6 = pnand %p1619_p5, %p2486_p1 }
  0x1a   : > { %p1741_p13 = por %p1740_p12, %p1739_p11 }
  0x1b   : > { %p2127_p7 = pneg %p2117_p6 }
  0x1d   : > { %p1734_p9 = pnand %p1732_p8, %p2127_p7 }
  0x1f   : > { %p1735_p10 = pneg %p1734_p9 }
  0x21   : > { %p1742_p0 = pnand %p1741_p13, %p1735_p10 }
  0x23   : > { %1745 = shalt.err (!%p1742_p0)
}
  0x24   : > { %s2015_s28 = smov 128   ;;  %s2016_s29 = smov 8  }
  0x25   : > { %s2499_s1 = sld [smem:[#allocation23_spill]]  ;;  %s1757_s12 = scalar_lea.vmem %s2121_s22, 2048 }
  0x26   : > { %p1758_p2 = scmp.ne.s32.totalorder %s2121_s22, %s1757_s12  ;;  %p1765_p9 = scmp.lt.s32.totalorder %s2121_s22, %s2121_s22 }
  0x27   : > { %p1766_p10 = scmp.lt.s32.totalorder %s1757_s12, %s1757_s12 }
  0x28   : > { %p1760_p5 = pnand %p1758_p2, %p2127_p7 }
  0x29   : > { %p1767_p11 = por %p1766_p10, %p1765_p9 }
  0x2a   : > { %p1761_p8 = pneg %p1760_p5 }
  0x2b   : > { %1622 = dma.hbm_to_vmem [thread:$0]  (!%p2117_p6), %s2499_s1, 512, %s302_s18, [#allocation6], %s2015_s28, %s2015_s28, %s2016_s29  }
  0x2c   : > { %p1768_p12 = pnand %p1767_p11, %p1761_p8 }
  0x2e   : > { %1771 = shalt.err (!%p1768_p12)
}
  0x2f   : > { %s2500_s3 = sld [smem:[#allocation25_spill]]  ;;  %s1783_s18 = scalar_lea.vmem %s2123_s25, 64 }
  0x30   : > { %p1784_p13 = scmp.ne.s32.totalorder %s2123_s25, %s1783_s18  ;;  %p1791_p5 = scmp.lt.s32.totalorder %s2123_s25, %s2123_s25 }
  0x31   : > { %p1792_p8 = scmp.lt.s32.totalorder %s1783_s18, %s1783_s18 }
  0x32   : > { %p1786_p0 = pnand %p1784_p13, %p2127_p7 }
  0x33   : > { %p1793_p9 = por %p1792_p8, %p1791_p5 }
  0x34   : > { %p1787_p2 = pneg %p1786_p0 }
  0x35   : > { %1628 = dma.hbm_to_vmem [thread:$0]  (!%p2117_p6), %s2500_s3, 2048, %s2121_s22, [#allocation9], %s2015_s28, %s2015_s28, %s2016_s29  }
  0x36   : > { %p1794_p10 = pnand %p1793_p9, %p1787_p2 }
  0x38   : > { %1797 = shalt.err (!%p1794_p10)
}
  0x39   : > { %s2501_s2 = sld [smem:[#allocation24_spill]]  ;;  %s2017_s22 = smov [#allocation10]  }
  0x3a   : > { %s339_s30 = sshll.u32 %s2017_s22, 4  ;;  %s2018_s11 = smov [#allocation11]   ;;  %s340_s30 = int_to_ptr.vmem [resolvable:$true] %s339_s30 }
  0x3b   : > { %s352_s12 = sshll.u32 %s2018_s11, 4  ;;  %s1809_s17 = scalar_lea.vmem %s340_s30, 64  ;;  %s353_s12 = int_to_ptr.vmem [resolvable:$true] %s352_s12 }
  0x3c   : > { %p1810_p11 = scmp.ne.s32.totalorder %s340_s30, %s1809_s17  ;;  %p1817_p0 = scmp.lt.s32.totalorder %s340_s30, %s340_s30 }
  0x3d   : > { %p1818_p2 = scmp.lt.s32.totalorder %s1809_s17, %s1809_s17 }
  0x3e   : > { %p1812_p12 = pnand %p1810_p11, %p2127_p7 }
  0x3f   : > { %1625 = dma.hbm_to_vmem [thread:$0]  (!%p2117_p6), %s2501_s2, 64, %s2123_s25, [#allocation6]  }
  0x40   : > { %p1813_p13 = pneg %p1812_p12  ;;  %p1819_p5 = por %p1818_p2, %p1817_p0 }
  0x42   : > { %p1820_p8 = pnand %p1819_p5, %p1813_p13 }
  0x44   : > { %1823 = shalt.err (!%p1820_p8)
}
  0x45   : > { %s2502_s4 = sld [smem:[#allocation26_spill]]  ;;  %s1835_s25 = scalar_lea.vmem %s353_s12, 512 }
  0x46   : > { %p1836_p9 = scmp.ne.s32.totalorder %s353_s12, %s1835_s25  ;;  %p1843_p11 = scmp.lt.s32.totalorder %s353_s12, %s353_s12 }
  0x47   : > { %p1844_p12 = scmp.lt.s32.totalorder %s1835_s25, %s1835_s25 }
  0x48   : > { %p1838_p10 = pnand %p1836_p9, %p2127_p7 }
  0x49   : > { %p1845_p1 = por %p1844_p12, %p1843_p11 }
  0x4a   : > { %p1839_p4 = pneg %p1838_p10 }
  0x4b   : > { %1631 = dma.hbm_to_vmem [thread:$0]  (!%p2117_p6), %s2502_s4, 64, %s340_s30, [#allocation9]  }
  0x4c   : > { %p1846_p3 = pnand %p1845_p1, %p1839_p4 }
  0x4e   : > { %1849 = shalt.err (!%p1846_p3)
}
  0x4f   : > { %s2503_s6 = sld [smem:[#allocation27_spill]]  ;;  %s2488_s23 = sadd.s32 4294967294, %s2010_s16  }
  0x50   : > { %s2187_s26 = sadd.s32 1, %s2010_s16   ;;  %s40_s22 = sadd.s32 1, %s2006_s15 }
  0x51   : > { %s37_s30 = ssub.s32 %s2010_s16, %s2187_s26  ;;  %p47_p1 = scmp.ne.s32.totalorder %s2006_s15, %s2002_s14 }
  0x52   : > { %p38_p3 = scmp.eq.s32.totalorder %s37_s30, 0  ;;  %p48_p4 = scmp.eq.s32.totalorder %s2010_s16, 0 }
  0x53   : > { %p53_p7 = scmp.ne.s32.totalorder %s2002_s14, %s1998_s13  ;;  %p224_p13 = scmp.eq.s32.totalorder %s2103_s19, 1 }
  0x54   : > { %s2199_s11 = scalar_select %p38_p3, %s2006_s15, %s40_s22  }
  0x55   : > { %1634 = dma.hbm_to_vmem [thread:$0]  (!%p2117_p6), %s2503_s6, 512, %s353_s12, [#allocation12], %s2015_s28, %s2015_s28, %s2016_s29  }
  0x56   : > { %p49_p0 = por %p48_p4, %p47_p1  ;;  %p2504_p2 = scmp.eq.s32.totalorder %s2103_s19, 0 }
  0x57   : > { %p2207_p6 = por %p224_p13, %p47_p1  ;;  %p230_p8 = scmp.eq.s32.totalorder %s2488_s23, 1 }
  0x58   : > { %p2203_p5 = por %p2504_p2, %p53_p7  ;;  %p1654_p9 = scmp.lt.s32.totalorder %s2010_s16, 2 }
  0x59   : > { %s2506_s28 = scalar_select %p2207_p6, 1, 0 }
  0x5a   : > { %s2505_s17 = scalar_select %p2203_p5, 1, 0 }
  0x5b   : > { %s369_s29 = sand.u32 1, %s2006_s15   ;;  %p2215_p10 = por %p230_p8, %p53_p7 }
  0x5c   : > { %s1446_s21 = sshll.u32 %s369_s29, 3  ;;  %s1447_s18 = sshll.u32 %s2010_s16, 7 }
  0x5d   : > { %s2507_s12 = scalar_select %p2215_p10, 1, 0 }
  0x5e   : > { %s2223_s27 = scalar_lea.hbm %s2475_s0, %s1447_s18  ;;  %s373_s22 = scalar_lea.vmem [#allocation2], %s1446_s21 }
  0x5f   : > { %s380_s30 = sshll.u32 %s373_s22, 4  ;;  %p2225_p11 = pnand %p1654_p9, %p49_p0  ;;  %s381_s30 = int_to_ptr.vmem [resolvable:$true] %s380_s30 }
  0x60   : > { %s370_s1 = scalar_lea.sflag [#allocation3], %s369_s29  ;;  %s1850_s2 = scalar_lea.hbm %s2223_s27, 128 }
  0x61   : > { %p1851_p12 = scmp.ne.s32.totalorder %s2223_s27, %s1850_s2  ;;  %p1852_p1 = pneg %p2225_p11 }
  0x62   : > { %s1855_s24 = scalar_lea.hbm %s2475_s0, 256  ;;  %p1856_p7 = scmp.lt.s32.totalorder %s2223_s27, %s2475_s0 }
  0x63   : > { %p1853_p3 = pnand %p1852_p1, %p1851_p12  ;;  %p1857_p13 = scmp.lt.s32.totalorder %s1855_s24, %s1850_s2 }
  0x65   : > { %p1854_p4 = pneg %p1853_p3  ;;  %p1858_p0 = por %p1857_p13, %p1856_p7 }
  0x67   : > { %p1859_p2 = pnand %p1858_p0, %p1854_p4 }
  0x69   : > { %1862 = shalt.err (!%p1859_p2)
}
  0x6a   : > { %s1863_s22 = scalar_lea.vmem %s381_s30, 128  ;;  %s2019_s29 = smov [#allocation2]  }
  0x6b   : > { %p1864_p8 = scmp.ne.s32.totalorder %s381_s30, %s1863_s22  ;;  %s1868_s4 = sshll.u32 %s2019_s29, 4  ;;  %s1869_s4 = int_to_ptr.vmem [resolvable:$false] %s1868_s4 }
  0x6c   : > { %s1870_s6 = scalar_lea.vmem %s1869_s4, 256  ;;  %p1871_p12 = scmp.lt.s32.totalorder %s381_s30, %s1869_s4 }
  0x6d   : > { %p1866_p9 = pnand %p1864_p8, %p1852_p1  ;;  %p1872_p3 = scmp.lt.s32.totalorder %s1870_s6, %s1863_s22 }
  0x6f   : > { %p1867_p10 = pneg %p1866_p9  ;;  %p1873_p6 = por %p1872_p3, %p1871_p12 }
  0x71   : > { %p1874_p5 = pnand %p1873_p6, %p1867_p10 }
  0x73   : > { %1877 = shalt.err (!%p1874_p5)
}
  0x74   : > { %1638 = dma.hbm_to_vmem [thread:$0]  (!%p2225_p11), %s2223_s27, 128, %s381_s30, %s370_s1  }
  0x75   : > { %p2509_p4 = scmp.ne.s32.totalorder %s2496_s20, 0 }
  0x76   : > { %s2246_s2 = sand.u32 (!%p2509_p4), 1, %s2002_s14   ;;  %p2510_p6 = scmp.ne.s32.totalorder (!%p2509_p4), %s2505_s17, 0 }
  0x77   : > { %389 = sbr.rel (%p2509_p4) target bundleno = 2495 (0x9bf), region = 52  ;;  %s2249_s3 = sshll.u32 (!%p2509_p4), %s2246_s2, 3 }
  0x78   : > { %s392_s4 = scalar_lea.sflag (!%p2509_p4), [#allocation3], %s2246_s2  ;;  %s395_s6 = scalar_lea.vmem (!%p2509_p4), [#allocation2], %s2249_s3 }
  0x7c   : > { %1973 = dma.done.wait (%p2510_p6), %s392_s4, 128  }
  0x7d   : > { %1975 = vsyncadd (%p2510_p6), %s392_s4, 4294967168  ;;  %p2511_p5 = scmp.eq.s32.totalorder %s2103_s19, 0 }
  0x7f   : > { %1977 = dma.done.wait (%p2511_p5), [#allocation6], 576   ;;  %p2512_p10 = pmov %p2511_p5 }
  0x80   : > { %p2513_p11 = pmov %p2511_p5 }
  0x81   : > { %1979 = vsyncadd (%p2512_p10), [#allocation6], 4294966720 }
  0x82   : > { %1981 = dma.done.wait (%p2513_p11), [#allocation9], 2112   ;;  %p2514_p1 = pmov %p2511_p5 }
  0x84   : > { %1983 = vsyncadd (%p2514_p1), [#allocation9], 4294965184  ;;  %p2515_p7 = pmov %p2514_p1 }
  0x85   : > { %p2516_p13 = pmov %p2514_p1 }
  0x86   : > { %1985 = dma.done.wait (%p2515_p7), [#allocation12], 512  }
  0x87   : > { %1987 = vsyncadd (%p2516_p13), [#allocation12], 4294966784  ;;  %v542_v0 = vlaneseq  ;;  %v2020_v1 = vmov 0.0   ;;  %vm2021_vm0 = vmmov 0   ;;  %v466_v4 = vld [vmem:[#allocation5 + $0x18] sm:$0xff]  ;;  %v465_v5 = vld [vmem:[#allocation5 + $0x10] sm:$0xff] }
  0x88   : > { %1515 = vmatprep.subr.mxu0 %v2020_v1  ;;  %1523 = vmatprep.mubr.msk.f32.mxu0 %vm2021_vm0, %v2020_v1  ;;  %v2278_v6 = vld [vmem:[#allocation7] sm:$0xf]  ;;  %v464_v7 = vld [vmem:[#allocation5 + $0x8] sm:$0xff]  ;;  %s2022_s1 = smov 32   ;;  %v462_v10 = vld [vmem:[%s395_s6] sm:$0xff]  ;;  %vm468_vm1 = vcmask 261120  }
  0x89   : > { %v2272_v2 = vshrl.u32 %v542_v0, 7  ;;  %1526 = vmatprep.subr.mxu1 %v2020_v1  ;;  %1534 = vmatprep.mubr.msk.f32.mxu1 %vm2021_vm0, %v2020_v1  ;;  %v463_v9 = vld [vmem:[#allocation5] sm:$0xff]  ;;  %s2023_s20 = smov 96   ;;  %v595_v33 = vld [vmem:[#allocation8 + $0x10] sm:$0xff]  ;;  %v594_v35 = vld [vmem:[#allocation8 + $0x8] sm:$0xff]  ;;  %s454_s23 = scalar_lea.vmem [#allocation14], %s2249_s3 }
  0x8a   : > { %1516 = vmatpush3.msra.mxu0 %v466_v4  ;;  %v596_v31 = vld [vmem:[#allocation8 + $0x18] sm:$0xff]  ;;  %v678_v34 = vld [vmem:[#allocation8 + $0x30] sm:$0xff]  ;;  %v677_v36 = vld [vmem:[#allocation8 + $0x28] sm:$0xff]  ;;  %vm912_vm2 = vcmask 64512   ;;  %s461_s30 = scalar_lea.vmem [#allocation16], %s2249_s3  ;;  %s1214_s24 = sand.u32 1, %s2103_s19  }
  0x8b   : > { %v549_v3 = vsub.s32 1, %v2272_v2  ;;  %1517 = vmatprep.subr.mxu0 %v2020_v1  ;;  %v544_v15 = vsub.s32 0, %v2272_v2  ;;  %1527 = vmatpush3.msra.mxu1 %v596_v31  ;;  %v679_v32 = vld [vmem:[#allocation8 + $0x38] sm:$0xff]  ;;  %v593_v37 = vld [vmem:[#allocation8] sm:$0xff]  ;;  %v584_v42 = vsub.s32 2, %v2272_v2  ;;  %v589_v43 = vsub.s32 3, %v2272_v2 }
  0x8c   : > { %1518 = vmatpush3.msra.mxu0 %v465_v5  ;;  %1528 = vmatprep.subr.mxu1 %v2020_v1  ;;  %v676_v38 = vld [vmem:[#allocation8 + $0x20] sm:$0xff]  ;;  %v759_v50 = vld [vmem:[#allocation8 + $0x58] sm:$0xff]  ;;  %v758_v51 = vld [vmem:[#allocation8 + $0x50] sm:$0xff]  ;;  %s2387_s21 = sshll.u32 %s2103_s19, 7  ;;  %s1246_s6 = sshll.u32 %s454_s23, 4  ;;  %s1247_s6 = int_to_ptr.vmem [resolvable:$true] %s1246_s6 }
  0x8d   : > { %v550_v8 = vrot.slane %v2278_v6, %v549_v3  ;;  %1519 = vmatprep.subr.mxu0 %v2020_v1  ;;  %v545_v16 = vrot.slane %v2278_v6, %v544_v15  ;;  %1529 = vmatpush3.msra.mxu1 %v595_v33  ;;  %v585_v44 = vrot.slane %v2278_v6, %v584_v42  ;;  %v757_v52 = vld [vmem:[#allocation8 + $0x48] sm:$0xff]  ;;  %v756_v53 = vld [vmem:[#allocation8 + $0x40] sm:$0xff]  ;;  %s1244_s4 = scalar_lea.hbm %s2484_s9, %s2387_s21  ;;  %p2517_p2 = scmp.ne.s32.totalorder %s2506_s28, 0 }
  0x8e   : > { %1520 = vmatpush3.msra.mxu0 %v464_v7  ;;  %1530 = vmatprep.subr.mxu1 %v2020_v1  ;;  %v590_v46 = vrot.slane %v2278_v6, %v589_v43  ;;  %v1462_v54 = vld [vmem:[#allocation10 + $0x1] ss:$0 sm:$0xff]  ;;  %v1460_v57 = vld [vmem:[#allocation10] ss:$0 sm:$0xff]  ;;  %v1464_v62 = vld [vmem:[#allocation10 + $0x2] ss:$0 sm:$0xff] }
  0x8f   : > { %552 = vrot.lane.b32.xlu0 %v550_v8, %s2022_s1  ;;  %1521 = vmatprep.subr.mxu0 %v2020_v1  ;;  %v835_v5 = vld [vmem:[%s2480_s5] sm:$0xff]  ;;  %v1469_v31 = vld [vmem:[#allocation10 + $0x3] ss:$0 sm:$0xff]  ;;  %s2024_s17 = smov [#allocation14]  }
  0x90   : > { %1522 = vmatpush3.msra.mxu0 %v463_v9  ;;  %1531 = vmatpush3.msra.mxu1 %v594_v35  ;;  %s1882_s27 = sshll.u32 %s2024_s17, 4  ;;  %s1883_s27 = int_to_ptr.vmem [resolvable:$false] %s1882_s27 }
  0x91   : > { %1524 = vmatmul.mubr.msk.f32.vlgmr.msra.gmra.mxu0 %vm468_vm1, %v462_v10  ;;  %1537 = vmatprep.subr.mxu0 %v2020_v1  ;;  %s1884_s19 = scalar_lea.vmem %s1883_s27, 256  ;;  %p1885_p12 = scmp.lt.s32.totalorder %s1247_s6, %s1883_s27 }
  0x92   : > { %1545 = vmatprep.mubr.msk.f32.mxu0 %vm2021_vm0, %v2020_v1  ;;  %1538 = vmatpush3.msra.mxu0 %v679_v32 }
  0x93   : > { %1539 = vmatprep.subr.mxu0 %v2020_v1  ;;  %1532 = vmatprep.subr.mxu1 %v2020_v1 }
  0x94   : > { %1540 = vmatpush3.msra.mxu0 %v678_v34  ;;  %1533 = vmatpush3.msra.mxu1 %v593_v37 }
  0x95   : > { %1541 = vmatprep.subr.mxu0 %v2020_v1  ;;  %1548 = vmatprep.subr.mxu1 %v2020_v1 }
  0x96   : > { %1542 = vmatpush3.msra.mxu0 %v677_v36 }
  0x97   : > { %1543 = vmatprep.subr.mxu0 %v2020_v1 }
  0x98   : > { %1544 = vmatpush3.msra.mxu0 %v676_v38 }
  0x99   : > { %1559 = vmatprep.subr.mxu0 %v2020_v1 }
 0x101   : > { %v553_v11 = vpop.permute.xlu0 %552 }
 0x151   : > { %v538_v12 = vpop.f32.mrf.mxu0 }
 0x152   : > { %v555_v13 = vadd.f32 %v553_v11, %v538_v12  ;;  %v546_v17 = vadd.f32 %v545_v16, %v538_v12  ;;  %v1002_v16 = vld [vmem:[#allocation8 + $0x78] sm:$0xff] }
 0x153   : > { %v1525_v14 = vpop.f32.mrf.mxu0 }
 0x154   : > { %563 = vrot.lane.b32.xlu0 %v555_v13, %s2023_s20  ;;  %v1459_v18 = vmul.f32 -1.442695, %v546_v17  ;;  %v1001_v17 = vld [vmem:[#allocation8 + $0x70] sm:$0xff] }
 0x156   : > { %1704 = vpow2.f32 %v1459_v18  ;;  %v1000_v18 = vld [vmem:[#allocation8 + $0x68] sm:$0xff] }
 0x163   : > { %v1705_v19 = vpop.eup %1704 }
 0x164   : > { %v559_v20 = vadd.f32 1.0, %v1705_v19 }
 0x166   : > { %1706 = vrcp.f32 %v559_v20 }
 0x173   : > { %v1707_v21 = vpop.eup %1706 }
 0x1c6   : > { %v564_v22 = vpop.permute.xlu0 %563 }
 0x1c7   : > { %v566_v23 = vmul.f32 %v1707_v21, %v564_v22  ;;  %v999_v22 = vld [vmem:[#allocation8 + $0x60] sm:$0xff] }
 0x1c9   : > { %v567_v24 = vadd.f32 %v566_v23, %v462_v10  ;;  %v1084_v23 = vld [vmem:[#allocation11 + $0x18] sm:$0xff] }
 0x1cb   : > { %v568_v25 = vsel %vm468_vm1, %v567_v24, 0.0 }
 0x1cc   : > { %569 = vadd.xlane.f32.xlu1 %v568_v25 }
 0x255   : > { %v570_v26 = vpop.xlane.xlu1 %569 }
 0x256   : > { %v572_v27 = vmul.f32 0.03125, %v570_v26 }
 0x258   : > { %v573_v28 = vsub.f32 %v567_v24, %v572_v27  ;;  %v1083_v24 = vld [vmem:[#allocation11 + $0x10] sm:$0xff]  ;;  %v1082_v27 = vld [vmem:[#allocation11 + $0x8] sm:$0xff] }
 0x25a   : > { %v574_v29 = vmul.f32 %v573_v28, %v573_v28 }
 0x25c   : > { %v575_v30 = vsel %vm468_vm1, %v574_v29, 0.0  ;;  %v2367_v29 = vld [vmem:[%s2482_s7] sm:$0xf] }
 0x25d   : > { %576 = vadd.xlane.f32.xlu1 %v575_v30  ;;  %v1167_v30 = vrot.slane %v2367_v29, %v549_v3  ;;  %v1162_v38 = vrot.slane %v2367_v29, %v544_v15 }
 0x2e6   : > { %v577_v39 = vpop.xlane.xlu1 %576 }
 0x2e7   : > { %v578_v40 = vmul.f32 0.03125, %v577_v39 }
 0x2e9   : > { %v579_v41 = vadd.f32 1e-05, %v578_v40 }
 0x2eb   : > { %1708 = vrsqrt.f32 %v579_v41 }
 0x2f8   : > { %v1709_v45 = vpop.eup %1708 }
 0x2f9   : > { %v581_v47 = vmul.f32 %v1709_v45, %v573_v28  ;;  %v1081_v28 = vld [vmem:[#allocation11] sm:$0xff] }
 0x2fb   : > { %v586_v48 = vmul.f32 %v585_v44, %v581_v47 }
 0x2fd   : > { %v2316_v49 = vadd.f32 %v590_v46, %v586_v48 }
 0x2ff   : > { %1535 = vmatmul.mubr.msk.f32.vlgmr.msra.gmra.mxu1 %vm468_vm1, %v2316_v49  ;;  %1546 = vmatmul.mubr.msk.f32.vlgmr.msra.gmra.mxu0 %vm468_vm1, %v2316_v49  ;;  %592 = vst.msk [vmem:[%s454_s23] sm:$0xff] %vm468_vm1, %v2316_v49 }
 0x300   : > { %1549 = vmatpush3.msra.mxu1 %v759_v50  ;;  %1556 = vmatprep.mubr.msk.f32.mxu1 %vm2021_vm0, %v2020_v1 }
 0x301   : > { %1550 = vmatprep.subr.mxu1 %v2020_v1  ;;  %1561 = vmatprep.mubr.msk.f32.mxu0 %vm2021_vm0, %v2020_v1 }
 0x302   : > { %1551 = vmatpush3.msra.mxu1 %v758_v51 }
 0x303   : > { %1552 = vmatprep.subr.mxu1 %v2020_v1 }
 0x304   : > { %1553 = vmatpush3.msra.mxu1 %v757_v52 }
 0x305   : > { %1554 = vmatprep.subr.mxu1 %v2020_v1 }
 0x306   : > { %1555 = vmatpush3.msra.mxu1 %v756_v53 }
 0x307   : > { %1557 = vmatmul.mubr.msk.f32.vlgmr.msra.gmra.mxu1 %vm468_vm1, %v2316_v49  ;;  %1564 = vmatprep.subr.mxu1 %v2020_v1 }
 0x308   : > { %1566 = vmatprep.mubr.msk.f32.mxu1 %vm2021_vm0, %v2020_v1 }
 0x3bf   : > { %v671_v55 = vpop.f32.mrf.mxu1  ;;  %v751_v56 = vpop.f32.mrf.mxu0 }
 0x3c0   : > { %v752_v58 = vadd.f32 %v1462_v54, %v751_v56  ;;  %v672_v61 = vadd.f32 %v1460_v57, %v671_v55 }
 0x3c1   : > { %v1536_v59 = vpop.f32.mrf.mxu1  ;;  %v1547_v60 = vpop.f32.mrf.mxu0 }
 0x3c2   : > { %1560 = vmatpush3.xpose.msk.msra.mxu0 %vm468_vm1, %v752_v58 }
 0x3c3   : > { %1569 = vmatprep.subr.mxu0 %v2020_v1 }
 0x3c5   : > { %1562 = vmatmul.mubr.msk.f32.vlgmr.msra.gmra.mxu0 %vm468_vm1, %v672_v61 }
 0x3c6   : > { %1577 = vmatprep.mubr.msk.f32.mxu0 %vm2021_vm0, %v2020_v1  ;;  %1570 = vmatpush3.msra.mxu0 %v1002_v16 }
 0x3c7   : > { %v831_v63 = vpop.f32.mrf.mxu1  ;;  %1571 = vmatprep.subr.mxu0 %v2020_v1 }
 0x3c8   : > { %v832_v0 = vadd.f32 %v1464_v62, %v831_v63  ;;  %1572 = vmatpush3.msra.mxu0 %v1001_v17 }
 0x3c9   : > { %v1558_v4 = vpop.f32.mrf.mxu1  ;;  %1573 = vmatprep.subr.mxu0 %v2020_v1 }
 0x3ca   : > { %1565 = vmatpush3.msra.mxu1 %v832_v0  ;;  %1574 = vmatpush3.msra.mxu0 %v1000_v18 }
 0x3cb   : > { %1580 = vmatprep.subr.mxu1 %v2020_v1  ;;  %1575 = vmatprep.subr.mxu0 %v2020_v1 }
 0x3cc   : > { %1576 = vmatpush3.msra.mxu0 %v999_v22 }
 0x485   : > { %v908_v6 = vpop.f32.mrf.mxu0 }
 0x486   : > { %v909_v7 = vadd.f32 %v908_v6, %v835_v5 }
 0x487   : > { %v1563_v8 = vpop.f32.mrf.mxu0 }
 0x488   : > { %v913_v9 = vsel %vm912_vm2, %v909_v7, -inf }
 0x489   : > { %914 = vmax.xlane.f32.xlu0 %v913_v9 }
 0x512   : > { %v915_v10 = vpop.xlane.xlu0 %914 }
 0x513   : > { %v916_v11 = vsub.f32 %v909_v7, %v915_v10 }
 0x515   : > { %v917_v12 = vmul.f32 1.442695, %v916_v11 }
 0x517   : > { %1710 = vpow2.f32 %v917_v12 }
 0x524   : > { %v1711_v13 = vpop.eup %1710 }
 0x525   : > { %v919_v14 = vsel %vm912_vm2, %v1711_v13, 0.0 }
 0x526   : > { %920 = vadd.xlane.f32.xlu1 %v919_v14 }
 0x537   : > { %1169 = vrot.lane.b32.xlu1 %v1167_v30, %s2022_s1  ;;  %s2395_s1 = scalar_lea.sflag [#allocation15], %s1214_s24 }
 0x5af   : > { %v921_v19 = vpop.xlane.xlu1 %920 }
 0x5b0   : > { %1712 = vrcp.f32 %v921_v19 }
 0x5bd   : > { %v1713_v20 = vpop.eup %1712 }
 0x5be   : > { %v923_v21 = vmul.f32 %v1713_v20, %v1711_v13 }
 0x5c0   : > { %1567 = vmatmul.mubr.msk.f32.vlgmr.msra.gmra.mxu1 %vm912_vm2, %v923_v21  ;;  %924 = vst.msk [vmem:[%s461_s30] sm:$0xff] %vm912_vm2, %v923_v21 }
 0x5c1   : > { %1588 = vmatprep.mubr.msk.f32.mxu1 %vm2021_vm0, %v2020_v1  ;;  %1581 = vmatpush3.msra.mxu1 %v1084_v23 }
 0x5c2   : > { %1582 = vmatprep.subr.mxu1 %v2020_v1 }
 0x5c3   : > { %1583 = vmatpush3.msra.mxu1 %v1083_v24 }
 0x5c4   : > { %1584 = vmatprep.subr.mxu1 %v2020_v1 }
 0x5c5   : > { %1585 = vmatpush3.msra.mxu1 %v1082_v27 }
 0x5c6   : > { %1586 = vmatprep.subr.mxu1 %v2020_v1  ;;  %v1170_v1 = vpop.permute.xlu1 %1169 }
 0x5c7   : > { %1587 = vmatpush3.msra.mxu1 %v1081_v28 }
 0x680   : > { %v994_v25 = vpop.f32.mrf.mxu1 }
 0x681   : > { %1578 = vmatmul.mubr.msk.f32.vlgmr.msra.gmra.mxu0 %vm468_vm1, %v994_v25 }
 0x682   : > { %v1568_v26 = vpop.f32.mrf.mxu1 }
 0x741   : > { %v1077_v32 = vpop.f32.mrf.mxu0 }
 0x742   : > { %v1078_v33 = vadd.f32 %v1469_v31, %v1077_v32 }
 0x743   : > { %v1579_v34 = vpop.f32.mrf.mxu0 }
 0x744   : > { %1589 = vmatmul.mubr.msk.f32.vlgmr.msra.gmra.mxu1 %vm468_vm1, %v1078_v33 }
 0x804   : > { %v1155_v35 = vpop.f32.mrf.mxu1 }
 0x805   : > { %v1172_v36 = vadd.f32 %v1170_v1, %v1155_v35  ;;  %v1163_v39 = vadd.f32 %v1162_v38, %v1155_v35 }
 0x806   : > { %v1590_v37 = vpop.f32.mrf.mxu1 }
 0x807   : > { %1180 = vrot.lane.b32.xlu1 %v1172_v36, %s2023_s20  ;;  %v1472_v3 = vmul.f32 -1.442695, %v1163_v39  ;;  %s1878_s20 = scalar_lea.vmem %s1247_s6, 128 }
 0x808   : > { %p1879_p0 = scmp.ne.s32.totalorder %s1247_s6, %s1878_s20  ;;  %p1886_p3 = scmp.lt.s32.totalorder %s1884_s19, %s1878_s20 }
 0x809   : > { %1714 = vpow2.f32 %v1472_v3 }
 0x80a   : > { %p1880_p8 = pnand %p1879_p0, %p2517_p2  ;;  %p1887_p4 = por %p1886_p3, %p1885_p12 }
 0x80c   : > { %p1881_p9 = pneg %p1880_p8 }
 0x80e   : > { %p1888_p6 = pnand %p1887_p4, %p1881_p9 }
 0x816   : > { %v1715_v40 = vpop.eup %1714 }
 0x817   : > { %v1176_v41 = vadd.f32 1.0, %v1715_v40 }
 0x819   : > { %1716 = vrcp.f32 %v1176_v41 }
 0x826   : > { %v1717_v44 = vpop.eup %1716 }
 0x879   : > { %v1181_v45 = vpop.permute.xlu1 %1180 }
 0x87a   : > { %v1183_v46 = vmul.f32 %v1717_v44, %v1181_v45 }
 0x87c   : > { %v1184_v47 = vadd.f32 %v1183_v46, %v2316_v49 }
 0x87e   : > { %v1185_v48 = vsel %vm468_vm1, %v1184_v47, 0.0 }
 0x87f   : > { %1186 = vadd.xlane.f32.xlu1 %v1185_v48 }
 0x908   : > { %v1187_v50 = vpop.xlane.xlu1 %1186 }
 0x909   : > { %v1188_v15 = vmul.f32 0.03125, %v1187_v50 }
 0x90b   : > { %v2380_v51 = vsub.f32 %v1184_v47, %v1188_v15 }
 0x90d   : > { %v1190_v52 = vmul.f32 %v2380_v51, %v2380_v51 }
 0x90f   : > { %v1191_v53 = vsel %vm468_vm1, %v1190_v52, 0.0 }
 0x910   : > { %1192 = vadd.xlane.f32.xlu0 %v1191_v53 }
 0x911   : > { %1891 = shalt.err (!%p1888_p6)
}
 0x912   : > { %s1892_s18 = scalar_lea.hbm %s1244_s4, 128  ;;  %s1896_s24 = scalar_lea.hbm %s2484_s9, 256 }
 0x913   : > { %p1893_p5 = scmp.ne.s32.totalorder %s1244_s4, %s1892_s18  ;;  %p1897_p1 = scmp.lt.s32.totalorder %s1244_s4, %s2484_s9 }
 0x914   : > { %p1898_p7 = scmp.lt.s32.totalorder %s1896_s24, %s1892_s18 }
 0x915   : > { %p1894_p10 = pnand %p1893_p5, %p2517_p2 }
 0x916   : > { %p1899_p13 = por %p1898_p7, %p1897_p1 }
 0x917   : > { %p1895_p11 = pneg %p1894_p10 }
 0x919   : > { %p1900_p0 = pnand %p1899_p13, %p1895_p11 }
 0x91b   : > { %1903 = shalt.err (!%p1900_p0)
}
 0x91c   : > { %1614 = dma.vmem_to_hbm [thread:$0]  (%p2517_p2), %s1247_s6, 128, %s1244_s4, %s2395_s1  }
 0x91d   : > { %s1257_s27 = scalar_lea.hbm %s2485_s10, %s2387_s21  ;;  %s1259_s19 = sshll.u32 %s461_s30, 4  ;;  %s1260_s19 = int_to_ptr.vmem [resolvable:$true] %s1259_s19 }
 0x91e   : > { %s1904_s23 = scalar_lea.vmem %s1260_s19, 128  ;;  %s2025_s18 = smov [#allocation16]  }
 0x91f   : > { %p1905_p8 = scmp.ne.s32.totalorder %s1260_s19, %s1904_s23  ;;  %s1908_s25 = sshll.u32 %s2025_s18, 4  ;;  %s1909_s25 = int_to_ptr.vmem [resolvable:$false] %s1908_s25 }
 0x920   : > { %s1910_s24 = scalar_lea.vmem %s1909_s25, 256  ;;  %p1911_p3 = scmp.lt.s32.totalorder %s1260_s19, %s1909_s25 }
 0x921   : > { %p1906_p9 = pnand %p1905_p8, %p2517_p2  ;;  %p1912_p4 = scmp.lt.s32.totalorder %s1910_s24, %s1904_s23 }
 0x923   : > { %p1907_p12 = pneg %p1906_p9  ;;  %p1913_p6 = por %p1912_p4, %p1911_p3 }
 0x925   : > { %p1914_p5 = pnand %p1913_p6, %p1907_p12 }
 0x927   : > { %1917 = shalt.err (!%p1914_p5)
}
 0x928   : > { %s1918_s4 = scalar_lea.hbm %s1257_s27, 128  ;;  %s1922_s22 = scalar_lea.hbm %s2485_s10, 256 }
 0x929   : > { %p1919_p10 = scmp.ne.s32.totalorder %s1257_s27, %s1918_s4  ;;  %p1923_p7 = scmp.lt.s32.totalorder %s1257_s27, %s2485_s10 }
 0x92a   : > { %p1924_p13 = scmp.lt.s32.totalorder %s1922_s22, %s1918_s4 }
 0x92b   : > { %p1920_p11 = pnand %p1919_p10, %p2517_p2 }
 0x92c   : > { %p1925_p0 = por %p1924_p13, %p1923_p7 }
 0x92d   : > { %p1921_p1 = pneg %p1920_p11 }
 0x92f   : > { %p1926_p8 = pnand %p1925_p0, %p1921_p1 }
 0x931   : > { %1929 = shalt.err (!%p1926_p8)
}
 0x932   : > { %1615 = dma.vmem_to_hbm [thread:$0]  (%p2517_p2), %s1260_s19, 128, %s1257_s27, %s2395_s1   ;;  %v1201_v56 = vrot.slane %v2367_v29, %v584_v42  ;;  %v1206_v58 = vrot.slane %v2367_v29, %v589_v43 }
 0x933   : > { %s447_s17 = scalar_lea.vmem [#allocation13], %s2249_s3  ;;  %s1231_s19 = scalar_lea.hbm %s2483_s8, %s2387_s21 }
 0x934   : > { %s1233_s23 = sshll.u32 %s447_s17, 4  ;;  %s1210_s18 = scalar_lea.sflag [#allocation4], %s2246_s2  ;;  %s1234_s23 = int_to_ptr.vmem [resolvable:$true] %s1233_s23 }
 0x935   : > { %s1930_s25 = scalar_lea.vmem %s1234_s23, 128  ;;  %s2026_s24 = smov [#allocation13]  }
 0x936   : > { %p1931_p9 = scmp.ne.s32.totalorder %s1234_s23, %s1930_s25  ;;  %s1934_s4 = sshll.u32 %s2026_s24, 4  ;;  %s1935_s4 = int_to_ptr.vmem [resolvable:$false] %s1934_s4 }
 0x937   : > { %s1936_s3 = scalar_lea.vmem %s1935_s4, 256  ;;  %p1937_p4 = scmp.lt.s32.totalorder %s1234_s23, %s1935_s4 }
 0x938   : > { %p1932_p12 = pnand %p1931_p9, %p2517_p2  ;;  %p1938_p6 = scmp.lt.s32.totalorder %s1936_s3, %s1930_s25 }
 0x93a   : > { %p1933_p3 = pneg %p1932_p12  ;;  %p1939_p5 = por %p1938_p6, %p1937_p4 }
 0x93c   : > { %p1940_p10 = pnand %p1939_p5, %p1933_p3 }
 0x999   : > { %v1193_v49 = vpop.xlane.xlu0 %1192 }
 0x99a   : > { %v1194_v54 = vmul.f32 0.03125, %v1193_v49 }
 0x99c   : > { %v1195_v55 = vadd.f32 1e-05, %v1194_v54 }
 0x99e   : > { %1718 = vrsqrt.f32 %v1195_v55 }
 0x9ab   : > { %v1719_v57 = vpop.eup %1718 }
 0x9ac   : > { %v1197_v59 = vmul.f32 %v1719_v57, %v2380_v51 }
 0x9ae   : > { %v1202_v60 = vmul.f32 %v1201_v56, %v1197_v59 }
 0x9b0   : > { %v1207_v61 = vadd.f32 %v1206_v58, %v1202_v60 }
 0x9b2   : > { %1208 = vst.msk [vmem:[%s447_s17] sm:$0xff] %vm468_vm1, %v1207_v61 }
 0x9b3   : > { %1943 = shalt.err (!%p1940_p10)
}
 0x9b4   : > { %s1944_s30 = scalar_lea.hbm %s1231_s19, 128  ;;  %s1948_s6 = scalar_lea.hbm %s2483_s8, 256 }
 0x9b5   : > { %p1945_p11 = scmp.ne.s32.totalorder %s1231_s19, %s1944_s30  ;;  %p1949_p13 = scmp.lt.s32.totalorder %s1231_s19, %s2483_s8 }
 0x9b6   : > { %p1950_p0 = scmp.lt.s32.totalorder %s1948_s6, %s1944_s30 }
 0x9b7   : > { %p1946_p1 = pnand %p1945_p11, %p2517_p2 }
 0x9b8   : > { %p1951_p8 = por %p1950_p0, %p1949_p13 }
 0x9b9   : > { %p1947_p7 = pneg %p1946_p1 }
 0x9bb   : > { %p1952_p9 = pnand %p1951_p8, %p1947_p7 }
 0x9bd   : > { %1955 = shalt.err (!%p1952_p9)
}
 0x9be   : > { %1613 = dma.vmem_to_hbm [thread:$0]  (%p2517_p2), %s1234_s23, 128, %s1231_s19, %s1210_s18  }
 0x9bf PF: > { %s1271_s20 = sand.u32 1, %s1998_s13   ;;  %p2518_p12 = scmp.ne.s32.totalorder %s2507_s12, 0 }
 0x9c0   : > { %p2519_p3 = scmp.ge.s32.totalorder %s2010_s16, 2  ;;  %s1272_s17 = scalar_lea.sflag [#allocation4], %s1271_s20 }
 0x9c2   : > { %p1640_p4 = pnand %p2519_p3, %p2518_p12 }
 0x9c4   : > { %p1641_p6 = pneg %p1640_p4 }
 0x9c6   : > { %1989 = dma.done.wait (%p1641_p6), %s1272_s17, 128  }
 0x9c7   : > { %1991 = vsyncadd (%p1641_p6), %s1272_s17, 4294967168  ;;  %s2520_s1 = sadd.s32 4294967294, %s2010_s16  }
 0x9c8   : > { %s1280_s27 = sand.u32 1, %s2520_s1  }
 0x9c9   : > { %s1281_s25 = scalar_lea.sflag [#allocation15], %s1280_s27 }
 0x9ca   : > { %1993 = dma.done.wait (%p1641_p6), %s1281_s25, 256  }
 0x9cb   : > { %1995 = vsyncadd (%p1641_p6), %s1281_s25, 4294967040  ;;  %p30_p2 = scmp.ge.s32.totalorder %s2187_s26, 4   ;;  %s2521_s13 = smov %s2002_s14 }
 0x9cc   : > { %s2522_s14 = smov %s2006_s15  ;;  %s2523_s15 = smov %s2199_s11 }
 0x9cd   : > { %s2524_s16 = smov %s2187_s26  ;;  %32 = sbr.rel (!%p30_p2) target bundleno = 16 (0x10), region = 152 }
 0x9d2   :  { %1295 = vsyncpa [#allocation3], 1 }
 0x9d3   :  { %1297 = vsyncpa [#allocation3 + $0x1], 1 }
 0x9d4   :  { %1298 = vsyncpa [#allocation6], 1 }
 0x9d5   :  { %1299 = vsyncpa [#allocation9], 1 }
 0x9d6   :  { %1300 = vsyncpa [#allocation12], 1 }
 0x9d7   :  { %1301 = vsyncpa [#allocation4], 1 }
 0x9d8   :  { %1303 = vsyncpa [#allocation4 + $0x1], 1 }
 0x9d9   :  { %1304 = vsyncpa [#allocation15], 1 }
 0x9da   :  { %1306 = vsyncpa [#allocation15 + $0x1], 1 }

</bundles_post_ra>
